<compile_context>
chip_gen: v6e
topology: v6e:2x2x1
jax: 0.10.0
libtpu: 0.0.40
codegen_flags: <defaults>
</compile_context>

<pallas_src>
import jax
import jax.numpy as jnp
from jax import lax
from jax.experimental import pallas as pl
from jax.experimental.pallas import tpu as pltpu

THRESHOLD = 0.8
COMP_THRESHOLD = 1.0 - THRESHOLD            # self.comp_threshold
INV_COMP_THRESHOLD = 1.0 / COMP_THRESHOLD
COS_EPS = 1e-8                              # F.cosine_similarity default eps
COS_EPS2 = COS_EPS * COS_EPS

LANE = 128
TB_TARGET = 256                             # batch rows per grid step
TK_TARGET = 1024                            # D_in columns per grid step
_VMEM_SOFT_CAP = 48 << 20                   # stay under v7x's 64 MiB physical VMEM
_VMEM_DEFAULT_SAFE = 14 << 20               # below v5e's 16 MiB default scoped budget


def _round_up(a, m):
    return (a + m - 1) // m * m


def _cdiv(a, b):
    return -(-a // b)


def _choose_k_tiling(d_in, tk_target=TK_TARGET):
    """Pad D_in to lane granularity only; pick TK that divides the padded size."""
    d128 = _round_up(d_in, LANE)
    if d128 <= tk_target:
        return d128, d128, 1                          # tk, d_in_p, n_k
    n_k = _cdiv(d128, tk_target)
    tk = _round_up(_cdiv(d128, n_k), LANE)
    return tk, tk * n_k, n_k


def _choose_batch_tiling(batch, tb_target=TB_TARGET):
    """Pick TB / n_b; keep n_b >= 2 for B >= 16 so v7x can use both TensorCores."""
    if batch < 16:
        return batch, 1, batch                        # tb, n_b, padded batch
    n_b = max(2, _cdiv(batch, tb_target))
    tb = _round_up(_cdiv(batch, n_b), 8)
    return tb, n_b, n_b * tb


def _vmem_bytes(tb, tk, d_in_p, d_emb, resident_w):
    """Conservative VMEM footprint (128-lane padding + double buffers assumed)."""
    lanes = _round_up(d_emb, LANE)
    act = 2 * (2 * tb * tk * 4)                       # x and y blocks, f32, 2 bufs each
    w_rows = d_in_p if resident_w else tk
    w = 2 * w_rows * lanes * 2                        # bf16 W, 2 bufs
    bias = 2 * 8 * lanes * 4
    acc = 2 * tb * lanes * 4                          # two resident f32 accumulators
    out = 2 * 8 * max(tb, LANE) * 4
    return act + w + bias + acc + out


def twin_kernel(x_ref, y_ref, w_ref, b_ref, out_ref, accx_ref, accy_ref):
    """One (batch tile, K tile) grid step.

    x_ref/y_ref : (TB, TK)                 f32   activation tiles (cast to bf16 here)
    w_ref       : (TK, De) or (D_in_p, De) bf16  streamed K-slice / VMEM-resident W
    b_ref       : (1, De)                  f32   embedding bias (resident)
    out_ref     : (1, 1, TB)               f32   lane-dense sigmoid(cos) for the tile
    accx/accy   : (TB, De)                 f32   resident accumulators across K
    """
    k = pl.program_id(1)
    tb, tk = x_ref.shape

    @pl.when(k == 0)
    def _init():
        accx_ref[...] = jnp.zeros_like(accx_ref)
        accy_ref[...] = jnp.zeros_like(accy_ref)

    if w_ref.shape[0] == tk:                          # streamed W (or single K tile)
        w = w_ref[...]
    else:                                             # resident W: slice the K tile here
        start = pl.multiple_of(k * tk, LANE)
        w = w_ref[pl.ds(start, tk), :]

    x = x_ref[...].astype(jnp.bfloat16)               # in-kernel cast (VPU has slack)
    y = y_ref[...].astype(jnp.bfloat16)
    accx_ref[...] += jnp.dot(x, w, preferred_element_type=jnp.float32)
    accy_ref[...] += jnp.dot(y, w, preferred_element_type=jnp.float32)

    @pl.when(k == pl.num_programs(1) - 1)
    def _finalize():
        bias = b_ref[...]
        ex = accx_ref[...] + bias                     # bias added once, in f32
        ey = accy_ref[...] + bias

        # F.cosine_similarity(ex, ey, dim=1, eps=1e-8):
        #   cos = dot / max(||ex|| * ||ey||, eps)  -- PyTorch clamps the product.
        dot_xy = jnp.sum(ex * ey, axis=-1)            # (TB,)
        nx2 = jnp.sum(ex * ex, axis=-1)
        ny2 = jnp.sum(ey * ey, axis=-1)
        cos = dot_xy * lax.rsqrt(jnp.maximum(nx2 * ny2, COS_EPS2))

        pred = jax.nn.sigmoid((cos - THRESHOLD) * INV_COMP_THRESHOLD)
        out_ref[...] = pred.reshape(1, tb)[None]      # lane-dense (1, 1, TB) store


def prepare_params(w, b):
    """Pad/cast the inner model's parameters once, outside the per-call path.

    W stays (D_in_p, D_emb) bf16: D_in is padded only to what the K tiling
    needs; D_emb is NOT lane-padded in HBM (4x less W streaming for De=32).
    """
    d_in, d_emb = w.shape
    _, d_in_p, _ = _choose_k_tiling(d_in)
    w_p = jnp.pad(w.astype(jnp.float32),
                  ((0, d_in_p - d_in), (0, 0))).astype(jnp.bfloat16)
    b_p = b.astype(jnp.float32).reshape(1, d_emb)
    return w_p, b_p


@jax.jit
def twin_forward(x_img, y_img, w_p, b_p):
    """x_img, y_img: (B, C, H, W) f32; w_p/b_p from prepare_params()."""
    batch = x_img.shape[0]
    xf = x_img.reshape(batch, -1)                     # row-major reshape: no copy
    yf = y_img.reshape(batch, -1)
    d_in = xf.shape[1]
    d_in_p, d_emb = w_p.shape

    tk, d_in_p_expected, n_k = _choose_k_tiling(d_in)
    if d_in_p != d_in_p_expected:
        raise ValueError(
            f"w_p prepared for a different D_in padding: got {d_in_p}, "
            f"expected {d_in_p_expected}; re-run prepare_params on the matching W.")

    tb, n_b, batch_p = _choose_batch_tiling(batch)

    # Only pad when strictly required (common aligned case: zero wrapper copies,
    # f32 activations stream straight from HBM and are cast in-kernel).
    if (batch_p, d_in_p) != (batch, d_in):
        pad = ((0, batch_p - batch), (0, d_in_p - d_in))
        xf = jnp.pad(xf, pad)
        yf = jnp.pad(yf, pad)

    # W residency: read W from HBM exactly once when the conservative budget
    # fits; otherwise stream (tk, D_emb) slices per K step (large TB amortizes).
    resident_w = _vmem_bytes(tb, tk, d_in_p, d_emb, True) <= _VMEM_SOFT_CAP
    if resident_w:
        w_spec = pl.BlockSpec((d_in_p, d_emb), lambda i, k: (0, 0))
    else:
        w_spec = pl.BlockSpec((tk, d_emb), lambda i, k: (k, 0))

    need = _vmem_bytes(tb, tk, d_in_p, d_emb, resident_w)
    vmem_limit = None
    if need > _VMEM_DEFAULT_SAFE:                     # v5e default scoped VMEM = 16 MiB
        vmem_limit = min(int(need * 1.25), _VMEM_SOFT_CAP)

    grid_spec = pltpu.PrefetchScalarGridSpec(
        num_scalar_prefetch=0,
        grid=(n_b, n_k),                              # K (reduction) axis last
        in_specs=[
            pl.BlockSpec((tb, tk), lambda i, k: (i, k)),    # x stream (f32)
            pl.BlockSpec((tb, tk), lambda i, k: (i, k)),    # y stream (f32)
            w_spec,                                         # W (resident or streamed)
            pl.BlockSpec((1, d_emb), lambda i, k: (0, 0)),  # bias resident
        ],
        out_specs=pl.BlockSpec((1, 1, tb), lambda i, k: (i, 0, 0)),  # lane-dense
        scratch_shapes=[pltpu.VMEM((tb, d_emb), jnp.float32),
                        pltpu.VMEM((tb, d_emb), jnp.float32)],
    )

    out = pl.pallas_call(
        twin_kernel,
        out_shape=jax.ShapeDtypeStruct((n_b, 1, tb), jnp.float32),
        grid_spec=grid_spec,
        compiler_params=pltpu.CompilerParams(
            dimension_semantics=("parallel", "arbitrary"),
            vmem_limit_bytes=vmem_limit),
    )(xf, yf, w_p, b_p)

    return out.reshape(batch_p)[:batch]               # PyTorch output shape: (B,)


def reference_forward(x_img, y_img, w, b, cast_bf16=True):
    """Pure-JAX reference mirroring the PyTorch semantics."""
    batch = x_img.shape[0]
    xf = x_img.reshape(batch, -1)
    yf = y_img.reshape(batch, -1)
    if cast_bf16:
        xf = xf.astype(jnp.bfloat16)
        yf = yf.astype(jnp.bfloat16)
        w = w.astype(jnp.bfloat16)
    ex = jnp.dot(xf, w, preferred_element_type=jnp.float32) + b
    ey = jnp.dot(yf, w, preferred_element_type=jnp.float32) + b
    dot = jnp.sum(ex * ey, axis=1)
    denom = jnp.linalg.norm(ex, axis=1) * jnp.linalg.norm(ey, axis=1)
    cos = dot / jnp.maximum(denom, COS_EPS)
    return jax.nn.sigmoid((cos - THRESHOLD) / COMP_THRESHOLD)


if __name__ == "__main__":
    # Small shapes: batch=2, channels=4, spatial=16, embedding dim=32.
    B, C, H, W = 2, 4, 16, 16
    D_IN, D_EMB = C * H * W, 32

    key = jax.random.PRNGKey(0)
    kx, ky, kw, kb = jax.random.split(key, 4)
    x = jax.random.normal(kx, (B, C, H, W), dtype=jnp.float32)
    y = jax.random.normal(ky, (B, C, H, W), dtype=jnp.float32)
    # Deterministic synthetic parameters for the inner face-identifier model.
    w_emb = jax.random.normal(kw, (D_IN, D_EMB), dtype=jnp.float32) * 0.02
    b_emb = jax.random.normal(kb, (D_EMB,), dtype=jnp.float32) * 0.02

    w_p, b_p = prepare_params(w_emb, b_emb)
    pred = twin_forward(x, y, w_p, b_p)
    pred = jax.block_until_ready(pred)

    assert pred.shape == (B,)
    ref_bf16 = reference_forward(x, y, w_emb, b_emb, cast_bf16=True)
    ref_f32 = reference_forward(x, y, w_emb, b_emb, cast_bf16=False)
    assert jnp.allclose(pred, ref_bf16, atol=2e-3, rtol=2e-3), (pred, ref_bf16)
    assert jnp.allclose(pred, ref_f32, atol=3e-2, rtol=3e-2), (pred, ref_f32)

    print("KERNEL_OK")
</pallas_src>

<mosaic_0001>
module attributes {stable_mosaic.version = 11 : i64} {
  func.func @twin_kernel(%arg0: i32, %arg1: i32, %arg2: memref<2x1024xf32, #tpu.memory_space<vmem>>, %arg3: memref<2x1024xf32, #tpu.memory_space<vmem>>, %arg4: memref<1024x32xbf16, #tpu.memory_space<vmem>>, %arg5: memref<1x32xf32, #tpu.memory_space<vmem>>, %arg6: memref<1x1x2xf32, #tpu.memory_space<vmem>>, %arg7: memref<2x32xf32, #tpu.memory_space<vmem>>, %arg8: memref<2x32xf32, #tpu.memory_space<vmem>>) attributes {dimension_semantics = [#tpu.dimension_semantics<parallel>, #tpu.dimension_semantics<arbitrary>], iteration_bounds = array<i64: 1, 1>, scalar_prefetch = 0 : i64, scratch_operands = 2 : i64, tpu.core_type = #tpu.core_type<tc>, window_params = [{transform_indices = @transform_0, window_bounds = array<i64: 2, 1024>}, {transform_indices = @transform_1, window_bounds = array<i64: 2, 1024>}, {pipeline_mode = #tpu.pipeline_mode<synchronous>, transform_indices = @transform_2, window_bounds = array<i64: 1024, 32>}, {pipeline_mode = #tpu.pipeline_mode<synchronous>, transform_indices = @transform_3, window_bounds = array<i64: 1, 32>}, {transform_indices = @transform_4, window_bounds = array<i64: 1, 1, 2>}]} {
    %c0_i32 = arith.constant 0 : i32
    %0 = arith.cmpi eq, %arg1, %c0_i32 : i32
    %1 = arith.extui %0 : i1 to i32
    %c0_i32_0 = arith.constant 0 : i32
    %2 = arith.cmpi ne, %1, %c0_i32_0 : i32
    scf.if %2 {
      %cst_17 = arith.constant 0.000000e+00 : f32
      %19 = vector.broadcast %cst_17 : f32 to vector<2x32xf32>
      %c0_18 = arith.constant 0 : index
      %c0_19 = arith.constant 0 : index
      %20 = vector.load %arg7[%c0_18, %c0_19] : memref<2x32xf32, #tpu.memory_space<vmem>>, vector<2x32xf32>
      tpu.vector_store %arg7[%c0_18, %c0_19], %19 {strides = array<i32>} : memref<2x32xf32, #tpu.memory_space<vmem>>, vector<2x32xf32>,
      %cst_20 = arith.constant 0.000000e+00 : f32
      %21 = vector.broadcast %cst_20 : f32 to vector<2x32xf32>
      %c0_21 = arith.constant 0 : index
      %c0_22 = arith.constant 0 : index
      %22 = vector.load %arg8[%c0_21, %c0_22] : memref<2x32xf32, #tpu.memory_space<vmem>>, vector<2x32xf32>
      tpu.vector_store %arg8[%c0_21, %c0_22], %21 {strides = array<i32>} : memref<2x32xf32, #tpu.memory_space<vmem>>, vector<2x32xf32>,
    } else {
    }
    %c0 = arith.constant 0 : index
    %c0_1 = arith.constant 0 : index
    %3 = vector.load %arg4[%c0, %c0_1] : memref<1024x32xbf16, #tpu.memory_space<vmem>>, vector<1024x32xbf16>
    %c0_2 = arith.constant 0 : index
    %c0_3 = arith.constant 0 : index
    %4 = vector.load %arg2[%c0_2, %c0_3] : memref<2x1024xf32, #tpu.memory_space<vmem>>, vector<2x1024xf32>
    %5 = arith.truncf %4 : vector<2x1024xf32> to vector<2x1024xbf16>
    %c0_4 = arith.constant 0 : index
    %c0_5 = arith.constant 0 : index
    %6 = vector.load %arg3[%c0_4, %c0_5] : memref<2x1024xf32, #tpu.memory_space<vmem>>, vector<2x1024xf32>
    %7 = arith.truncf %6 : vector<2x1024xf32> to vector<2x1024xbf16>
    %c0_6 = arith.constant 0 : index
    %c0_7 = arith.constant 0 : index
    %8 = vector.load %arg7[%c0_6, %c0_7] : memref<2x32xf32, #tpu.memory_space<vmem>>, vector<2x32xf32>
    %cst = arith.constant dense<0.000000e+00> : vector<2x32xf32>
    %9 = tpu.matmul %5, %3, %cst {dimension_numbers = #tpu.dot_dimension_numbers<[1], [0], [0], [1], [0, 0, 1, 1], [], []>} : vector<2x1024xbf16>, vector<1024x32xbf16>, vector<2x32xf32> -> vector<2x32xf32>
    %10 = arith.addf %8, %9 : vector<2x32xf32>
    %c0_8 = arith.constant 0 : index
    %c0_9 = arith.constant 0 : index
    %11 = vector.load %arg7[%c0_8, %c0_9] : memref<2x32xf32, #tpu.memory_space<vmem>>, vector<2x32xf32>
    tpu.vector_store %arg7[%c0_8, %c0_9], %10 {strides = array<i32>} : memref<2x32xf32, #tpu.memory_space<vmem>>, vector<2x32xf32>,
    %c0_10 = arith.constant 0 : index
    %c0_11 = arith.constant 0 : index
    %12 = vector.load %arg8[%c0_10, %c0_11] : memref<2x32xf32, #tpu.memory_space<vmem>>, vector<2x32xf32>
    %cst_12 = arith.constant dense<0.000000e+00> : vector<2x32xf32>
    %13 = tpu.matmul %7, %3, %cst_12 {dimension_numbers = #tpu.dot_dimension_numbers<[1], [0], [0], [1], [0, 0, 1, 1], [], []>} : vector<2x1024xbf16>, vector<1024x32xbf16>, vector<2x32xf32> -> vector<2x32xf32>
    %14 = arith.addf %12, %13 : vector<2x32xf32>
    %c0_13 = arith.constant 0 : index
    %c0_14 = arith.constant 0 : index
    %15 = vector.load %arg8[%c0_13, %c0_14] : memref<2x32xf32, #tpu.memory_space<vmem>>, vector<2x32xf32>
    tpu.vector_store %arg8[%c0_13, %c0_14], %14 {strides = array<i32>} : memref<2x32xf32, #tpu.memory_space<vmem>>, vector<2x32xf32>,
    %c0_i32_15 = arith.constant 0 : i32
    %16 = arith.cmpi eq, %arg1, %c0_i32_15 : i32
    %17 = arith.extui %16 : i1 to i32
    %c0_i32_16 = arith.constant 0 : i32
    %18 = arith.cmpi ne, %17, %c0_i32_16 : i32
    scf.if %18 {
      %c0_17 = arith.constant 0 : index
      %c0_18 = arith.constant 0 : index
      %19 = vector.load %arg5[%c0_17, %c0_18] : memref<1x32xf32, #tpu.memory_space<vmem>>, vector<1x32xf32>
      %c0_19 = arith.constant 0 : index
      %c0_20 = arith.constant 0 : index
      %20 = vector.load %arg7[%c0_19, %c0_20] : memref<2x32xf32, #tpu.memory_space<vmem>>, vector<2x32xf32>
      %21 = vector.broadcast %19 : vector<1x32xf32> to vector<2x32xf32>
      %22 = arith.addf %20, %21 : vector<2x32xf32>
      %c0_21 = arith.constant 0 : index
      %c0_22 = arith.constant 0 : index
      %23 = vector.load %arg8[%c0_21, %c0_22] : memref<2x32xf32, #tpu.memory_space<vmem>>, vector<2x32xf32>
      %24 = vector.broadcast %19 : vector<1x32xf32> to vector<2x32xf32>
      %25 = arith.addf %23, %24 : vector<2x32xf32>
      %26 = arith.mulf %22, %25 : vector<2x32xf32>
      %cst_23 = arith.constant dense<0.000000e+00> : vector<2xf32>
      %27 = vector.multi_reduction <add>, %26, %cst_23 [1] : vector<2x32xf32> to vector<2xf32>
      %28 = arith.mulf %22, %22 : vector<2x32xf32>
      %cst_24 = arith.constant dense<0.000000e+00> : vector<2xf32>
      %29 = vector.multi_reduction <add>, %28, %cst_24 [1] : vector<2x32xf32> to vector<2xf32>
      %30 = arith.mulf %25, %25 : vector<2x32xf32>
      %cst_25 = arith.constant dense<0.000000e+00> : vector<2xf32>
      %31 = vector.multi_reduction <add>, %30, %cst_25 [1] : vector<2x32xf32> to vector<2xf32>
      %32 = arith.mulf %29, %31 : vector<2xf32>
      %cst_26 = arith.constant 1.000000e-16 : f32
      %33 = vector.broadcast %cst_26 : f32 to vector<2xf32>
      %34 = arith.maximumf %32, %33 : vector<2xf32>
      %35 = math.rsqrt %34 : vector<2xf32>
      %36 = arith.mulf %27, %35 : vector<2xf32>
      %cst_27 = arith.constant 8.000000e-01 : f32
      %37 = vector.broadcast %cst_27 : f32 to vector<2xf32>
      %38 = arith.subf %36, %37 : vector<2xf32>
      %cst_28 = arith.constant 5.000000e+00 : f32
      %39 = vector.broadcast %cst_28 : f32 to vector<2xf32>
      %40 = arith.mulf %38, %39 : vector<2xf32>
      %41 = arith.negf %40 : vector<2xf32>
      %42 = math.exp %41 : vector<2xf32>
      %cst_29 = arith.constant 1.000000e+00 : f32
      %43 = vector.broadcast %cst_29 : f32 to vector<2xf32>
      %44 = arith.addf %43, %42 : vector<2xf32>
      %45 = arith.divf %43, %44 : vector<2xf32>
      %46 = vector.shape_cast %45 : vector<2xf32> to vector<1x2xf32>
      %47 = vector.shape_cast %46 : vector<1x2xf32> to vector<1x1x2xf32>
      %c0_30 = arith.constant 0 : index
      %c0_31 = arith.constant 0 : index
      %c0_32 = arith.constant 0 : index
      %48 = vector.load %arg6[%c0_30, %c0_31, %c0_32] : memref<1x1x2xf32, #tpu.memory_space<vmem>>, vector<1x1x2xf32>
      tpu.vector_store %arg6[%c0_30, %c0_31, %c0_32], %47 {strides = array<i32>} : memref<1x1x2xf32, #tpu.memory_space<vmem>>, vector<1x1x2xf32>,
    } else {
    }
    return
  }
  func.func @transform_0(%arg0: i32, %arg1: i32) -> (i32, i32) {
    %c0_i32 = arith.constant 0 : i32
    return %arg0, %arg1 : i32, i32
  }
  func.func @transform_1(%arg0: i32, %arg1: i32) -> (i32, i32) {
    %c0_i32 = arith.constant 0 : i32
    return %arg0, %arg1 : i32, i32
  }
  func.func @transform_2(%arg0: i32, %arg1: i32) -> (i32, i32) {
    %c0_i32 = arith.constant 0 : i32
    %c0_i32_0 = arith.constant 0 : i32
    %c0_i32_1 = arith.constant 0 : i32
    return %c0_i32, %c0_i32_0 : i32, i32
  }
  func.func @transform_3(%arg0: i32, %arg1: i32) -> (i32, i32) {
    %c0_i32 = arith.constant 0 : i32
    %c0_i32_0 = arith.constant 0 : i32
    %c0_i32_1 = arith.constant 0 : i32
    return %c0_i32, %c0_i32_0 : i32, i32
  }
  func.func @transform_4(%arg0: i32, %arg1: i32) -> (i32, i32, i32) {
    %c0_i32 = arith.constant 0 : i32
    %c0_i32_0 = arith.constant 0 : i32
    %c0_i32_1 = arith.constant 0 : i32
    return %arg0, %c0_i32, %c0_i32_0 : i32, i32, i32
  }
}

</mosaic_0001>

<bundles_post_ra>
// kernel: twin_forward.1
= control target key start
LH: loop header
LB: loop body
LE: loop exit
PB: predicated region body
PF: predicated region fallthrough
CT: control target
= control target key end

     0   :  { %v1911_v28 = vlaneseq  ;;  %v1377_v36 = vmov 1983009808   ;;  %s1906_s0 = inlined_call_operand.vmem [shape: f32[2,1024], index: 0, kind: input, shape index: {}]   ;;  %s1907_s1 = inlined_call_operand.vmem [shape: f32[2,1024], index: 1, kind: input, shape index: {}]   ;;  %s1908_s2 = inlined_call_operand.vmem [shape: bf16[1024,32], index: 2, kind: input, shape index: {}]   ;;  %s1909_s3 = inlined_call_operand.vmem [shape: f32[1,32], index: 3, kind: input, shape index: {}]   ;;  %s1910_s4 = inlined_call_operand.hbm [shape: f32[1,1,2], index: 4, kind: output, shape index: {}]  }
   0x1   :  { %v1408_v0 = vld [vmem:[%s1908_s2 + $0x78] sm:$0xff]   ;;  %v1431_v4 = vld [vmem:[%s1908_s2 + $0x70] sm:$0xff]   ;;  %v1455_v8 = vld [vmem:[%s1908_s2 + $0x68] sm:$0xff]   ;;  %v160_v37 = vunpack.c.l.s4 %v1377_v36 }
   0x2   :  { %v1413_v1 = vld [vmem:[%s1908_s2 + $0xf8] sm:$0xff]   ;;  %1102 = vmatprep.subr.bf16.mxu0 %v1408_v0  ;;  %v1437_v5 = vld [vmem:[%s1908_s2 + $0xf0] sm:$0xff]   ;;  %v1461_v9 = vld [vmem:[%s1908_s2 + $0xe8] sm:$0xff]   ;;  %v1596_v33 = vshrl.u32 %v1911_v28, 7 }
   0x3   :  { %v1419_v2 = vld [vmem:[%s1908_s2 + $0x38] sm:$0xff]   ;;  %1124 = vmatprep.subr.bf16.mxu1 %v1413_v1  ;;  %v1443_v6 = vld [vmem:[%s1908_s2 + $0x30] sm:$0xff]   ;;  %v1467_v10 = vld [vmem:[%s1908_s2 + $0x28] sm:$0xff]   ;;  %v161_v39 = vunpack.c.0.s8 %v160_v37 }
   0x4   :  { %v1425_v3 = vld [vmem:[%s1908_s2 + $0xb8] sm:$0xff]   ;;  %1103 = vmatpush3.bf16.msra.mxu0 %v1419_v2  ;;  %v1449_v7 = vld [vmem:[%s1908_s2 + $0xb0] sm:$0xff]   ;;  %v1473_v11 = vld [vmem:[%s1908_s2 + $0xa8] sm:$0xff]   ;;  %1926 = vst [vmem:[#allocation7_spill] sm:$0xff] %v1596_v33 }
   0x5   :  { %1125 = vmatpush3.bf16.msra.mxu1 %v1425_v3  ;;  %1104 = vmatprep.subr.bf16.mxu0 %v1431_v4  ;;  %v1479_v12 = vld [vmem:[%s1908_s2 + $0x60] sm:$0xff]   ;;  %v1503_v16 = vld [vmem:[%s1908_s2 + $0x58] sm:$0xff]   ;;  %v1527_v20 = vld [vmem:[%s1908_s2 + $0x50] sm:$0xff]   ;;  %v1616_v41 = vsub.s32 %v161_v39, %v1596_v33 }
   0x6   :  { %1126 = vmatprep.subr.bf16.mxu1 %v1437_v5  ;;  %v1485_v13 = vld [vmem:[%s1908_s2 + $0xe0] sm:$0xff]   ;;  %v1509_v17 = vld [vmem:[%s1908_s2 + $0xd8] sm:$0xff]   ;;  %v1533_v21 = vld [vmem:[%s1908_s2 + $0xd0] sm:$0xff]  }
   0x7   :  { %v1491_v14 = vld [vmem:[%s1908_s2 + $0x20] sm:$0xff]   ;;  %v1515_v18 = vld [vmem:[%s1908_s2 + $0x18] sm:$0xff]   ;;  %v1539_v22 = vld [vmem:[%s1908_s2 + $0x10] sm:$0xff]  }
   0x8   :  { %1105 = vmatpush3.bf16.msra.mxu0 %v1443_v6  ;;  %v1497_v15 = vld [vmem:[%s1908_s2 + $0xa0] sm:$0xff]   ;;  %v1521_v19 = vld [vmem:[%s1908_s2 + $0x98] sm:$0xff]   ;;  %v1545_v23 = vld [vmem:[%s1908_s2 + $0x90] sm:$0xff]  }
   0x9   :  { %1127 = vmatpush3.bf16.msra.mxu1 %v1449_v7  ;;  %1106 = vmatprep.subr.bf16.mxu0 %v1455_v8  ;;  %v1551_v24 = vld [vmem:[%s1908_s2 + $0x48] sm:$0xff]   ;;  %v1575_v29 = vld [vmem:[%s1908_s2 + $0x40] sm:$0xff]   ;;  %v1605_v35 = vld [vmem:[%s1908_s2 + $0x178] sm:$0xff]  }
   0xa   :  { %1128 = vmatprep.subr.bf16.mxu1 %v1461_v9  ;;  %v1557_v25 = vld [vmem:[%s1908_s2 + $0xc8] sm:$0xff]   ;;  %v1581_v30 = vld [vmem:[%s1908_s2 + $0xc0] sm:$0xff]   ;;  %v1612_v38 = vld [vmem:[%s1908_s2 + $0x1f8] sm:$0xff]  }
   0xb   :  { %v1563_v26 = vld [vmem:[%s1908_s2 + $0x8] sm:$0xff]   ;;  %v1587_v31 = vld [vmem:[%s1908_s2] sm:$0xff]   ;;  %v1623_v46 = vld [vmem:[%s1908_s2 + $0x138] sm:$0xff]  }
   0xc   :  { %1107 = vmatpush3.bf16.msra.mxu0 %v1467_v10  ;;  %v1569_v27 = vld [vmem:[%s1908_s2 + $0x88] sm:$0xff]   ;;  %v1593_v32 = vld [vmem:[%s1908_s2 + $0x80] sm:$0xff]   ;;  %v1628_v49 = vld [vmem:[%s1908_s2 + $0x1b8] sm:$0xff]  }
   0xd   :  { %1129 = vmatpush3.bf16.msra.mxu1 %v1473_v11  ;;  %1108 = vmatprep.subr.bf16.mxu0 %v1479_v12  ;;  %v154_v34 = vld [vmem:[%s1906_s0] sm:$0xff]  ;;  %v1633_v52 = vld [vmem:[%s1908_s2 + $0x170] sm:$0xff]   ;;  %v1655_v56 = vld [vmem:[%s1908_s2 + $0x168] sm:$0xff]  }
   0xe   :  { %1130 = vmatprep.subr.bf16.mxu1 %v1485_v13  ;;  %v158_v40 = vcombine.high %v154_v34, %v154_v34  ;;  %v165_v42 = vrot.slane %v154_v34, %v1616_v41  ;;  %v1638_v53 = vld [vmem:[%s1908_s2 + $0x1f0] sm:$0xff]   ;;  %v1662_v57 = vld [vmem:[%s1908_s2 + $0x1e8] sm:$0xff]   ;;  %v1679_v60 = vld [vmem:[%s1908_s2 + $0x160] sm:$0xff]  }
   0xf   :  { %v1643_v54 = vld [vmem:[%s1908_s2 + $0x130] sm:$0xff]   ;;  %v1667_v58 = vld [vmem:[%s1908_s2 + $0x128] sm:$0xff]   ;;  %v1686_v61 = vld [vmem:[%s1908_s2 + $0x1e0] sm:$0xff]  }
  0x10   :  { %1109 = vmatpush3.bf16.msra.mxu0 %v1491_v14  ;;  %v172_v43 = vrot.slane %v158_v40, %v1616_v41  ;;  %v173_v44 = vcombine.high %v165_v42, %v165_v42  ;;  %v200_v47 = vpack.c.bf16 %v165_v42, %v165_v42  ;;  %v1648_v55 = vld [vmem:[%s1908_s2 + $0x1b0] sm:$0xff]   ;;  %v1672_v59 = vld [vmem:[%s1908_s2 + $0x1a8] sm:$0xff]   ;;  %v1691_v62 = vld [vmem:[%s1908_s2 + $0x120] sm:$0xff]  }
  0x11   :  { %1131 = vmatpush3.bf16.msra.mxu1 %v1497_v15  ;;  %1110 = vmatprep.subr.bf16.mxu0 %v1503_v16  ;;  %v1696_v63 = vld [vmem:[%s1908_s2 + $0x1a0] sm:$0xff]   ;;  %v1703_v34 = vld [vmem:[%s1908_s2 + $0x158] sm:$0xff]   ;;  %v1727_v40 = vld [vmem:[%s1908_s2 + $0x150] sm:$0xff]  }
  0x12   :  { %1132 = vmatprep.subr.bf16.mxu1 %v1509_v17  ;;  %v174_v45 = vcombine.high %v172_v43, %v172_v43  ;;  %v202_v48 = vpack.c.bf16 %v172_v43, %v172_v43  ;;  %v201_v50 = vpack.c.bf16 %v173_v44, %v173_v44  ;;  %1927 = vst [vmem:[#allocation8_spill] sm:$0xff] %v1703_v34  ;;  %v1710_v36 = vld [vmem:[%s1908_s2 + $0x1d8] sm:$0xff]   ;;  %1931 = vst [vmem:[#allocation12_spill] sm:$0xff] %v1727_v40  ;;  %v1734_v42 = vld [vmem:[%s1908_s2 + $0x1d0] sm:$0xff]  }
  0x13   :  { %1928 = vst [vmem:[#allocation9_spill] sm:$0xff] %v1710_v36  ;;  %v1715_v37 = vld [vmem:[%s1908_s2 + $0x118] sm:$0xff]   ;;  %1932 = vst [vmem:[#allocation13_spill] sm:$0xff] %v1734_v42  ;;  %v1739_v43 = vld [vmem:[%s1908_s2 + $0x110] sm:$0xff]  }
  0x14   :  { %1111 = vmatpush3.bf16.msra.mxu0 %v1515_v18  ;;  %v203_v51 = vpack.c.bf16 %v174_v45, %v174_v45  ;;  %679 = vmatprep.mubr.bf16.mxu0 %v201_v50  ;;  %1929 = vst [vmem:[#allocation10_spill] sm:$0xff] %v1715_v37  ;;  %v1720_v39 = vld [vmem:[%s1908_s2 + $0x198] sm:$0xff]   ;;  %1933 = vst [vmem:[#allocation14_spill] sm:$0xff] %v1739_v43  ;;  %v1744_v44 = vld [vmem:[%s1908_s2 + $0x190] sm:$0xff]  }
  0x15   :  { %1133 = vmatpush3.bf16.msra.mxu1 %v1521_v19  ;;  %1112 = vmatprep.subr.bf16.mxu0 %v1527_v20  ;;  %1930 = vst [vmem:[#allocation11_spill] sm:$0xff] %v1720_v39  ;;  %1934 = vst [vmem:[#allocation15_spill] sm:$0xff] %v1744_v44  ;;  %v1751_v45 = vld [vmem:[%s1908_s2 + $0x148] sm:$0xff]   ;;  %v208_v50 = vld [vmem:[%s1907_s1] sm:$0xff] }
  0x16   :  { %1134 = vmatprep.subr.bf16.mxu1 %v1533_v21  ;;  %719 = vmatprep.mubr.bf16.mxu1 %v203_v51  ;;  %1935 = vst [vmem:[#allocation16_spill] sm:$0xff] %v1751_v45  ;;  %v212_v33 = vcombine.high %v208_v50, %v208_v50 }
  0x18   :  { %1113 = vmatpush3.bf16.msra.mxu0 %v1539_v22 }
  0x19   :  { %1135 = vmatpush3.bf16.msra.mxu1 %v1545_v23  ;;  %1114 = vmatprep.subr.bf16.mxu0 %v1551_v24 }
  0x1a   :  { %1136 = vmatprep.subr.bf16.mxu1 %v1557_v25 }
  0x1c   :  { %1115 = vmatpush3.bf16.msra.mxu0 %v1563_v26 }
  0x1d   :  { %1137 = vmatpush3.bf16.msra.mxu1 %v1569_v27  ;;  %1116 = vmatprep.subr.bf16.mxu0 %v1575_v29 }
  0x1e   :  { %1138 = vmatprep.subr.bf16.mxu1 %v1581_v30 }
  0x20   :  { %1117 = vmatpush3.bf16.msra.mxu0 %v1587_v31 }
  0x21   :  { %1139 = vmatpush3.bf16.msra.mxu1 %v1593_v32  ;;  %1146 = vmatprep.subr.bf16.mxu0 %v1605_v35 }
  0x22   :  { %1168 = vmatprep.subr.bf16.mxu1 %v1612_v38 }
  0x23   :  { %680 = vmatmul.mubr.bf16.vlgmr.msra.gmra.mxu0 %v200_v47  ;;  %v1758_v47 = vld [vmem:[%s1908_s2 + $0x1c8] sm:$0xff]  }
  0x24   :  { %720 = vmatmul.mubr.bf16.vlgmr.msra.gmra.mxu1 %v202_v48  ;;  %1147 = vmatpush3.bf16.msra.mxu0 %v1623_v46  ;;  %1936 = vst [vmem:[#allocation17_spill] sm:$0xff] %v1758_v47  ;;  %v155_v48 = vld [vmem:[%s1906_s0 + $0x8] sm:$0xff] }
  0x25   :  { %1169 = vmatpush3.bf16.msra.mxu1 %v1628_v49  ;;  %1148 = vmatprep.subr.bf16.mxu0 %v1633_v52  ;;  %v182_v51 = vrot.slane %v155_v48, %v1616_v41  ;;  %v175_v28 = vcombine.high %v155_v48, %v155_v48 }
  0x26   :  { %1170 = vmatprep.subr.bf16.mxu1 %v1638_v53 }
  0x28   :  { %1149 = vmatpush3.bf16.msra.mxu0 %v1643_v54 }
  0x29   :  { %1171 = vmatpush3.bf16.msra.mxu1 %v1648_v55  ;;  %1150 = vmatprep.subr.bf16.mxu0 %v1655_v56 }
  0x2a   :  { %1172 = vmatprep.subr.bf16.mxu1 %v1662_v57 }
  0x2c   :  { %1151 = vmatpush3.bf16.msra.mxu0 %v1667_v58 }
  0x2d   :  { %1173 = vmatpush3.bf16.msra.mxu1 %v1672_v59  ;;  %1152 = vmatprep.subr.bf16.mxu0 %v1679_v60 }
  0x2e   :  { %1174 = vmatprep.subr.bf16.mxu1 %v1686_v61 }
  0x30   :  { %1153 = vmatpush3.bf16.msra.mxu0 %v1691_v62 }
  0x31   :  { %1175 = vmatpush3.bf16.msra.mxu1 %v1696_v63  ;;  %1154 = vmatprep.subr.bf16.mxu0 %v1703_v34 }
  0x32   :  { %1176 = vmatprep.subr.bf16.mxu1 %v1710_v36 }
  0x34   :  { %1155 = vmatpush3.bf16.msra.mxu0 %v1715_v37 }
  0x35   :  { %1177 = vmatpush3.bf16.msra.mxu1 %v1720_v39  ;;  %1156 = vmatprep.subr.bf16.mxu0 %v1727_v40 }
  0x36   :  { %1178 = vmatprep.subr.bf16.mxu1 %v1734_v42 }
  0x37   :  { %9 = vsyncpa [#allocation5], 0  ;;  %v1772_v42 = vld [vmem:[%s1908_s2 + $0x108] sm:$0xff]   ;;  %v190_v39 = vcombine.high %v182_v51, %v182_v51  ;;  %v189_v37 = vrot.slane %v175_v28, %v1616_v41  ;;  %v1785_v48 = vld [vmem:[%s1908_s2 + $0x140] sm:$0xff]   ;;  %v1793_v34 = vrot.slane %v208_v50, %v1616_v41  ;;  %v1796_v28 = vrot.slane %v212_v33, %v1616_v41 }
  0x38   :  { %1157 = vmatpush3.bf16.msra.mxu0 %v1739_v43  ;;  %1937 = vst [vmem:[#allocation18_spill] sm:$0xff] %v1772_v42  ;;  %v1777_v40 = vld [vmem:[%s1908_s2 + $0x188] sm:$0xff]   ;;  %vm23_vm0 = vcmask 254976   ;;  %vm1019_vm1 = vcmask 8192  }
  0x39   :  { %1179 = vmatpush3.bf16.msra.mxu1 %v1744_v44  ;;  %1938 = vst [vmem:[#allocation19_spill] sm:$0xff] %v1777_v40  ;;  %1158 = vmatprep.subr.bf16.mxu0 %v1751_v45  ;;  %v1790_v44 = vld [vmem:[%s1908_s2 + $0x1c0] sm:$0xff]   ;;  %v205_v43 = vpack.c.bf16 %v190_v39, %v190_v39  ;;  %v191_v36 = vcombine.high %v189_v37, %v189_v37 }
  0x3a   :  { %1180 = vmatprep.subr.bf16.mxu1 %v1758_v47  ;;  %1939 = vst [vmem:[#allocation20_spill] sm:$0xff] %v1790_v44  ;;  %v1803_v47 = vld [vmem:[%s1908_s2 + $0x100] sm:$0xff]   ;;  %v227_v33 = vcombine.high %v1793_v34, %v1793_v34  ;;  %v228_v50 = vcombine.high %v1796_v28, %v1796_v28 }
  0x3b   :  { %v1808_v39 = vld [vmem:[%s1908_s2 + $0x180] sm:$0xff]   ;;  %v207_v45 = vpack.c.bf16 %v191_v36, %v191_v36  ;;  %759 = vmatprep.mubr.bf16.mxu0 %v205_v43 }
  0x3c   :  { %1159 = vmatpush3.bf16.msra.mxu0 %v1772_v42  ;;  %v206_v42 = vpack.c.bf16 %v189_v37, %v189_v37  ;;  %v255_v36 = vpack.c.bf16 %v227_v33, %v227_v33 }
  0x3d   :  { %1181 = vmatpush3.bf16.msra.mxu1 %v1777_v40  ;;  %1160 = vmatprep.subr.bf16.mxu0 %v1785_v48  ;;  %v204_v40 = vpack.c.bf16 %v182_v51, %v182_v51 }
  0x3e   :  { %1182 = vmatprep.subr.bf16.mxu1 %v1790_v44  ;;  %799 = vmatprep.mubr.bf16.mxu1 %v207_v45  ;;  %v257_v44 = vpack.c.bf16 %v228_v50, %v228_v50 }
  0x40   :  { %1161 = vmatpush3.bf16.msra.mxu0 %v1803_v47 }
  0x41   :  { %1183 = vmatpush3.bf16.msra.mxu1 %v1808_v39  ;;  %1190 = vmatprep.subr.bf16.mxu0 %v1408_v0  ;;  %v209_v0 = vld [vmem:[%s1907_s1 + $0x8] sm:$0xff] }
  0x42   :  { %1212 = vmatprep.subr.bf16.mxu1 %v1413_v1  ;;  %v229_v1 = vcombine.high %v209_v0, %v209_v0 }
  0x43   :  { %760 = vmatmul.mubr.bf16.vlgmr.msra.gmra.mxu0 %v204_v40  ;;  %v1099_v40 = vld [vmem:[%s1909_s3] ss:$0 sm:$0xff]  ;;  %s1379_s3 = smov [#allocation4]  }
  0x44   :  { %800 = vmatmul.mubr.bf16.vlgmr.msra.gmra.mxu1 %v206_v42  ;;  %1191 = vmatpush3.bf16.msra.mxu0 %v1419_v2  ;;  %v236_v2 = vrot.slane %v209_v0, %v1616_v41  ;;  %s1027_s20 = sshll.u32 %s1379_s3, 4  ;;  %s1028_s20 = int_to_ptr.vmem [resolvable:$true] %s1027_s20 }
  0x45   :  { %1213 = vmatpush3.bf16.msra.mxu1 %v1425_v3  ;;  %1192 = vmatprep.subr.bf16.mxu0 %v1431_v4  ;;  %v243_v3 = vrot.slane %v229_v1, %v1616_v41  ;;  %s1355_s21 = scalar_lea.vmem %s1028_s20, 16  ;;  %s1359_s22 = scalar_lea.vmem %s1028_s20, 32 }
  0x46   :  { %1214 = vmatprep.subr.bf16.mxu1 %v1437_v5  ;;  %843 = vmatprep.mubr.bf16.mxu0 %v255_v36  ;;  %v244_v4 = vcombine.high %v236_v2, %v236_v2  ;;  %p1356_p0 = scmp.ne.s32.totalorder %s1028_s20, %s1355_s21  ;;  %p1360_p1 = scmp.lt.s32.totalorder %s1028_s20, %s1028_s20 }
  0x47   :  { %883 = vmatprep.mubr.bf16.mxu1 %v257_v44  ;;  %v245_v5 = vcombine.high %v243_v3, %v243_v3  ;;  %p1361_p2 = scmp.lt.s32.totalorder %s1359_s22, %s1355_s21 }
  0x48   :  { %1193 = vmatpush3.bf16.msra.mxu0 %v1443_v6  ;;  %v254_v6 = vpack.c.bf16 %v1793_v34, %v1793_v34 }
  0x49   :  { %1215 = vmatpush3.bf16.msra.mxu1 %v1449_v7  ;;  %1194 = vmatprep.subr.bf16.mxu0 %v1455_v8  ;;  %v256_v7 = vpack.c.bf16 %v1796_v28, %v1796_v28  ;;  %v259_v8 = vpack.c.bf16 %v244_v4, %v244_v4  ;;  %p1362_p3 = por %p1361_p2, %p1360_p1 }
  0x4a   :  { %1216 = vmatprep.subr.bf16.mxu1 %v1461_v9  ;;  %v261_v9 = vpack.c.bf16 %v245_v5, %v245_v5 }
  0x4b   :  { %p1363_p4 = pnand %p1362_p3, %p1356_p0 }
  0x4c   :  { %1195 = vmatpush3.bf16.msra.mxu0 %v1467_v10  ;;  %v1940_v10 = vld [vmem:[#allocation8_spill] sm:$0xff] }
  0x4d   :  { %1217 = vmatpush3.bf16.msra.mxu1 %v1473_v11  ;;  %1196 = vmatprep.subr.bf16.mxu0 %v1479_v12  ;;  %v1941_v11 = vld [vmem:[#allocation9_spill] sm:$0xff]  ;;  %v1942_v12 = vld [vmem:[#allocation10_spill] sm:$0xff] }
  0x4e   :  { %1218 = vmatprep.subr.bf16.mxu1 %v1485_v13  ;;  %v1943_v13 = vld [vmem:[#allocation11_spill] sm:$0xff] }
  0x50   :  { %1197 = vmatpush3.bf16.msra.mxu0 %v1491_v14  ;;  %v1944_v14 = vld [vmem:[#allocation12_spill] sm:$0xff] }
  0x51   :  { %1219 = vmatpush3.bf16.msra.mxu1 %v1497_v15  ;;  %1198 = vmatprep.subr.bf16.mxu0 %v1503_v16  ;;  %v1945_v15 = vld [vmem:[#allocation13_spill] sm:$0xff]  ;;  %v1946_v16 = vld [vmem:[#allocation14_spill] sm:$0xff] }
  0x52   :  { %1220 = vmatprep.subr.bf16.mxu1 %v1509_v17  ;;  %v1947_v17 = vld [vmem:[#allocation15_spill] sm:$0xff] }
  0x54   :  { %1199 = vmatpush3.bf16.msra.mxu0 %v1515_v18  ;;  %v1948_v18 = vld [vmem:[#allocation16_spill] sm:$0xff] }
  0x55   :  { %1221 = vmatpush3.bf16.msra.mxu1 %v1521_v19  ;;  %1200 = vmatprep.subr.bf16.mxu0 %v1527_v20  ;;  %v1949_v19 = vld [vmem:[#allocation17_spill] sm:$0xff]  ;;  %v1950_v20 = vld [vmem:[#allocation18_spill] sm:$0xff] }
  0x56   :  { %1222 = vmatprep.subr.bf16.mxu1 %v1533_v21  ;;  %v1951_v21 = vld [vmem:[#allocation19_spill] sm:$0xff] }
  0x58   :  { %1201 = vmatpush3.bf16.msra.mxu0 %v1539_v22  ;;  %v1952_v22 = vld [vmem:[#allocation20_spill] sm:$0xff] }
  0x59   :  { %1223 = vmatpush3.bf16.msra.mxu1 %v1545_v23  ;;  %1202 = vmatprep.subr.bf16.mxu0 %v1551_v24  ;;  %v258_v23 = vpack.c.bf16 %v236_v2, %v236_v2  ;;  %v260_v24 = vpack.c.bf16 %v243_v3, %v243_v3 }
  0x5a   :  { %1224 = vmatprep.subr.bf16.mxu1 %v1557_v25  ;;  %v1378_v25 = vmov 0.0  }
  0x5b   :  { %24 = vst.msk [vmem:[#allocation2] sm:$0x3] %vm23_vm0, %v1378_v25  ;;  %25 = vst.msk [vmem:[#allocation3] sm:$0x3] %vm23_vm0, %v1378_v25 }
  0x5c   :  { %1203 = vmatpush3.bf16.msra.mxu0 %v1563_v26 }
  0x5d   :  { %1225 = vmatpush3.bf16.msra.mxu1 %v1569_v27  ;;  %1204 = vmatprep.subr.bf16.mxu0 %v1575_v29 }
  0x5e   :  { %1226 = vmatprep.subr.bf16.mxu1 %v1581_v30 }
  0x60   :  { %1205 = vmatpush3.bf16.msra.mxu0 %v1587_v31 }
  0x61   :  { %1227 = vmatpush3.bf16.msra.mxu1 %v1593_v32  ;;  %1234 = vmatprep.subr.bf16.mxu0 %v1605_v35 }
  0x62   :  { %1256 = vmatprep.subr.bf16.mxu1 %v1612_v38 }
  0x63   :  { %844 = vmatmul.mubr.bf16.vlgmr.msra.gmra.mxu0 %v254_v6 }
  0x64   :  { %884 = vmatmul.mubr.bf16.vlgmr.msra.gmra.mxu1 %v256_v7  ;;  %1235 = vmatpush3.bf16.msra.mxu0 %v1623_v46 }
  0x65   :  { %1257 = vmatpush3.bf16.msra.mxu1 %v1628_v49  ;;  %1236 = vmatprep.subr.bf16.mxu0 %v1633_v52 }
  0x66   :  { %1258 = vmatprep.subr.bf16.mxu1 %v1638_v53  ;;  %923 = vmatprep.mubr.bf16.mxu0 %v259_v8 }
  0x67   :  { %963 = vmatprep.mubr.bf16.mxu1 %v261_v9 }
  0x68   :  { %1237 = vmatpush3.bf16.msra.mxu0 %v1643_v54 }
  0x69   :  { %1259 = vmatpush3.bf16.msra.mxu1 %v1648_v55  ;;  %1238 = vmatprep.subr.bf16.mxu0 %v1655_v56 }
  0x6a   :  { %1260 = vmatprep.subr.bf16.mxu1 %v1662_v57 }
  0x6c   :  { %1239 = vmatpush3.bf16.msra.mxu0 %v1667_v58 }
  0x6d   :  { %1261 = vmatpush3.bf16.msra.mxu1 %v1672_v59  ;;  %1240 = vmatprep.subr.bf16.mxu0 %v1679_v60 }
  0x6e   :  { %1262 = vmatprep.subr.bf16.mxu1 %v1686_v61  ;;  %v262_v61 = vld [vmem:[#allocation2] sm:$0x3] }
  0x70   :  { %1241 = vmatpush3.bf16.msra.mxu0 %v1691_v62 }
  0x71   :  { %1263 = vmatpush3.bf16.msra.mxu1 %v1696_v63  ;;  %1242 = vmatprep.subr.bf16.mxu0 %v1940_v10 }
  0x72   :  { %1264 = vmatprep.subr.bf16.mxu1 %v1941_v11 }
  0x74   :  { %1243 = vmatpush3.bf16.msra.mxu0 %v1942_v12  ;;  %v810_v12 = vld [vmem:[#allocation3] sm:$0x3] }
  0x75   :  { %1265 = vmatpush3.bf16.msra.mxu1 %v1943_v13  ;;  %1244 = vmatprep.subr.bf16.mxu0 %v1944_v14 }
  0x76   :  { %1266 = vmatprep.subr.bf16.mxu1 %v1945_v15 }
  0x78   :  { %1245 = vmatpush3.bf16.msra.mxu0 %v1946_v16 }
  0x79   :  { %1267 = vmatpush3.bf16.msra.mxu1 %v1947_v17  ;;  %1246 = vmatprep.subr.bf16.mxu0 %v1948_v18 }
  0x7a   :  { %1268 = vmatprep.subr.bf16.mxu1 %v1949_v19 }
  0x7c   :  { %1247 = vmatpush3.bf16.msra.mxu0 %v1950_v20 }
  0x7d   :  { %1269 = vmatpush3.bf16.msra.mxu1 %v1951_v21  ;;  %1248 = vmatprep.subr.bf16.mxu0 %v1785_v48 }
  0x7e   :  { %1270 = vmatprep.subr.bf16.mxu1 %v1952_v22 }
  0x80   :  { %1249 = vmatpush3.bf16.msra.mxu0 %v1803_v47 }
  0x81   :  { %1271 = vmatpush3.bf16.msra.mxu1 %v1808_v39 }
  0x83   :  { %924 = vmatmul.mubr.bf16.vlgmr.msra.gmra.mxu0 %v258_v23 }
  0x84   :  { %964 = vmatmul.mubr.bf16.vlgmr.msra.gmra.mxu1 %v260_v24 }
  0xe3   :  { %v1118_v26 = vpop.f32.mrf.mxu0 }
  0xe4   :  { %v1140_v27 = vpop.f32.mrf.mxu1 }
  0xe5   :  { %v1119_v29 = vpop.f32.mrf.mxu0 }
  0xe6   :  { %v1141_v30 = vpop.f32.mrf.mxu1  ;;  %v1120_v41 = vadd.f32 %v1119_v29, %v1118_v26 }
  0xe7   :  { %v1121_v31 = vpop.f32.mrf.mxu0  ;;  %v1142_v46 = vadd.f32 %v1141_v30, %v1140_v27 }
  0xe8   :  { %v1143_v32 = vpop.f32.mrf.mxu1 }
  0xe9   :  { %v1122_v35 = vpop.f32.mrf.mxu0  ;;  %v722_v55 = vadd.f32 %v1142_v46, %v1120_v41  ;;  %v1953_v46 = vlaneseq }
  0xea   :  { %v1144_v38 = vpop.f32.mrf.mxu1 }
 0x103   :  { %v1162_v49 = vpop.f32.mrf.mxu0 }
 0x104   :  { %v1184_v52 = vpop.f32.mrf.mxu1 }
 0x105   :  { %v1163_v53 = vpop.f32.mrf.mxu0 }
 0x106   :  { %v1185_v54 = vpop.f32.mrf.mxu1  ;;  %v1164_v56 = vadd.f32 %v1163_v53, %v1162_v49  ;;  %v1013_v49 = vand.u32 127, %v1953_v46 }
 0x107   :  { %v1186_v57 = vadd.f32 %v1185_v54, %v1184_v52  ;;  %v1165_v58 = vpop.f32.mrf.mxu0  ;;  %v1954_v52 = vld [vmem:[#allocation7_spill] sm:$0xff] }
 0x108   :  { %v1187_v59 = vpop.f32.mrf.mxu1  ;;  %v762_v60 = vadd.f32 %v1164_v56, %v722_v55  ;;  %v1016_v53 = vsub.s32 %v1013_v49, %v1954_v52 }
 0x109   :  { %v1166_v62 = vpop.f32.mrf.mxu0 }
 0x10a   :  { %v1188_v63 = vpop.f32.mrf.mxu1  ;;  %v802_v34 = vadd.f32 %v1186_v57, %v762_v60 }
 0x10c   :  { %v807_v37 = vadd.f32 %v802_v34, %v262_v61 }
 0x10e   :  { %809 = vst.msk [vmem:[#allocation2] sm:$0x3] %vm23_vm0, %v807_v37 }
 0x115   :  { %v977_v42 = vld [vmem:[#allocation2] sm:$0x3] }
 0x116   :  { %v984_v43 = vadd.f32 %v1099_v40, %v977_v42 }
 0x118   :  { %v991_v44 = vmul.f32 %v984_v43, %v984_v43 }
 0x11a   :  { %v992_v45 = vsel %vm23_vm0, %v991_v44, 0.0 }
 0x11b   :  { %993 = vadd.xlane.f32.xlu0 %v992_v45 }
 0x123   :  { %v1206_v47 = vpop.f32.mrf.mxu0 }
 0x124   :  { %v1228_v51 = vpop.f32.mrf.mxu1 }
 0x125   :  { %v1207_v48 = vpop.f32.mrf.mxu0 }
 0x126   :  { %v1229_v28 = vpop.f32.mrf.mxu1  ;;  %v1208_v0 = vadd.f32 %v1207_v48, %v1206_v47 }
 0x127   :  { %v1209_v39 = vpop.f32.mrf.mxu0  ;;  %v1230_v1 = vadd.f32 %v1229_v28, %v1228_v51 }
 0x128   :  { %v1231_v33 = vpop.f32.mrf.mxu1 }
 0x129   :  { %v1210_v50 = vpop.f32.mrf.mxu0  ;;  %v886_v6 = vadd.f32 %v1230_v1, %v1208_v0 }
 0x12a   :  { %v1232_v36 = vpop.f32.mrf.mxu1 }
 0x143   :  { %v1250_v2 = vpop.f32.mrf.mxu0 }
 0x144   :  { %v1272_v3 = vpop.f32.mrf.mxu1 }
 0x145   :  { %v1251_v4 = vpop.f32.mrf.mxu0 }
 0x146   :  { %v1273_v5 = vpop.f32.mrf.mxu1  ;;  %v1252_v7 = vadd.f32 %v1251_v4, %v1250_v2 }
 0x147   :  { %v1253_v8 = vpop.f32.mrf.mxu0  ;;  %v1274_v11 = vadd.f32 %v1273_v5, %v1272_v3 }
 0x148   :  { %v1275_v9 = vpop.f32.mrf.mxu1  ;;  %v926_v10 = vadd.f32 %v1252_v7, %v886_v6 }
 0x149   :  { %v1254_v13 = vpop.f32.mrf.mxu0 }
 0x14a   :  { %v1276_v14 = vpop.f32.mrf.mxu1  ;;  %v966_v15 = vadd.f32 %v1274_v11, %v926_v10 }
 0x14c   :  { %v971_v16 = vadd.f32 %v966_v15, %v810_v12 }
 0x14e   :  { %972 = vst.msk [vmem:[#allocation3] sm:$0x3] %vm23_vm0, %v971_v16 }
 0x155   :  { %v985_v17 = vld [vmem:[#allocation3] sm:$0x3] }
 0x156   :  { %v986_v18 = vadd.f32 %v1099_v40, %v985_v17 }
 0x158   :  { %v995_v19 = vmul.f32 %v986_v18, %v986_v18  ;;  %v987_v20 = vmul.f32 %v986_v18, %v984_v43 }
 0x15a   :  { %v996_v21 = vsel %vm23_vm0, %v995_v19, 0.0  ;;  %v988_v22 = vsel %vm23_vm0, %v987_v20, 0.0 }
 0x15b   :  { %997 = vadd.xlane.f32.xlu0 %v996_v21  ;;  %989 = vadd.xlane.f32.xlu1 %v988_v22 }
 0x1a4   :  { %v994_v23 = vpop.xlane.xlu0 %993 }
 0x1e4   :  { %v998_v24 = vpop.xlane.xlu0 %997  ;;  %v990_v29 = vpop.xlane.xlu1 %989 }
 0x1e5   :  { %v999_v25 = vmul.f32 %v998_v24, %v994_v23 }
 0x1e7   :  { %v1000_v26 = vmax.f32 %v999_v25, 1e-16 }
 0x1e9   :  { %1349 = vrsqrt.f32 %v1000_v26 }
 0x1f6   :  { %v1350_v27 = vpop.eup %1349 }
 0x1f7   :  { %v1002_v30 = vmul.f32 %v1350_v27, %v990_v29 }
 0x1f9   :  { %v1100_v31 = vadd.f32 -0.8, %v1002_v30 }
 0x1fb   :  { %v1101_v32 = vmul.f32 -5.0, %v1100_v31 }
 0x1fd   :  { %v1006_v35 = vmul.f32 1.442695, %v1101_v32 }
 0x1ff   :  { %1351 = vpow2.f32 %v1006_v35 }
 0x20c   :  { %v1352_v38 = vpop.eup %1351 }
 0x20d   :  { %v1008_v41 = vadd.f32 1.0, %v1352_v38 }
 0x20f   :  { %1353 = vrcp.f32 %v1008_v41 }
 0x21c   :  { %v1354_v54 = vpop.eup %1353 }
 0x21d   :  { %v1017_v55 = vrot.slane %v1354_v54, %v1016_v53 }
 0x21f   :  { %1020 = vst.msk [vmem:[#allocation4] sm:$0x1] %vm1019_vm1, %v1017_v55 }
 0x220   :  { %1366 = shalt.err (!%p1363_p4)
}
 0x221   :  { %1030 = dma.vmem_to_hbm [thread:$0]  %s1028_s20, 16, %s1910_s4, [#allocation5]  }
 0x222   :  { %1375 = dma.done.wait [#allocation5], 16  }
 0x223   :  { %1376 = vsyncadd [#allocation5], 4294967280 }
 0x224   :  { %1034 = vsyncpa [#allocation5], 1 }

</bundles_post_ra>
